<compile_context>
chip_gen: v7x
topology: tpu7x:2x2x1
jax: 0.10.0
libtpu: 0.0.40
codegen_flags: <defaults>
</compile_context>

<pallas_src>
import functools
import math

import jax
import jax.numpy as jnp
from jax import lax
from jax.experimental import pallas as pl
from jax.experimental.pallas import tpu as pltpu


# --------------------- kernel 1: o = x + MHA(x), per batch -------------------
def mha_residual_kernel(x_ref, wqkv_ref, wo_ref, o_ref, *, n_heads):
    x = x_ref[...]                                        # (N, D) f32
    N, D = x.shape
    dk = D // n_heads

    xb = x.astype(jnp.bfloat16)
    # Fused QKV projection: one MXU matmul instead of three.
    qkv = jnp.dot(xb, wqkv_ref[...],
                  preferred_element_type=jnp.float32)     # (N, 3D) f32
    q = qkv[:, :D]              # 1/sqrt(dk) already folded into Wq (host side)
    k = qkv[:, D:2 * D]
    v = qkv[:, 2 * D:]

    heads = []
    for h in range(n_heads):                              # static, small
        qh = q[:, h * dk:(h + 1) * dk].astype(jnp.bfloat16)
        kh = k[:, h * dk:(h + 1) * dk].astype(jnp.bfloat16)
        vh = v[:, h * dk:(h + 1) * dk].astype(jnp.bfloat16)
        # scores = q @ k^T (contraction on dk, no explicit transpose)
        s = lax.dot_general(qh, kh, (((1,), (1,)), ((), ())),
                            preferred_element_type=jnp.float32)    # (N, N)
        s = s - jnp.max(s, axis=-1, keepdims=True)
        p = jnp.exp(s)
        p = p * pl.reciprocal(jnp.sum(p, axis=-1, keepdims=True), approx=True)
        heads.append(jnp.dot(p.astype(jnp.bfloat16), vh,
                             preferred_element_type=jnp.float32))  # (N, dk)

    concat = jnp.concatenate(heads, axis=-1)              # (N, D) f32
    mha = jnp.dot(concat.astype(jnp.bfloat16), wo_ref[...],
                  preferred_element_type=jnp.float32)     # single Wo matmul
    o_ref[...] = x + mha


# ------------------ kernel 2: BN1 -> FFN -> residual -> BN2 ------------------
def bn_ffn_bn_kernel(h_ref, g1_ref, be1_ref, w1_ref, b1_ref,
                     w2_ref, b2_ref, g2_ref, be2_ref, o_ref):
    eps = 1e-5
    h = h_ref[...]                                        # (B*N, D) f32

    mean1 = jnp.mean(h, axis=0, keepdims=True)
    var1 = jnp.mean((h - mean1) ** 2, axis=0, keepdims=True)
    h1 = (h - mean1) * lax.rsqrt(var1 + eps) * g1_ref[...] + be1_ref[...]

    ff = jnp.dot(h1.astype(jnp.bfloat16), w1_ref[...],
                 preferred_element_type=jnp.float32) + b1_ref[...]
    ff = jnp.maximum(ff, 0.0)
    ff = jnp.dot(ff.astype(jnp.bfloat16), w2_ref[...],
                 preferred_element_type=jnp.float32) + b2_ref[...]

    h2 = h1 + ff
    mean2 = jnp.mean(h2, axis=0, keepdims=True)
    var2 = jnp.mean((h2 - mean2) ** 2, axis=0, keepdims=True)
    o_ref[...] = (h2 - mean2) * lax.rsqrt(var2 + eps) * g2_ref[...] + be2_ref[...]


# ---------------------------- parameter preparation --------------------------
def prepare_params(raw, *, n_heads):
    """One-time host-side transform: fuse QKV, fold 1/sqrt(dk) into Wq,
    store all matmul weights as bf16 (halves weight VMEM/DMA bytes)."""
    wq, wk, wv, wo, g1, be1, w1, b1, w2, b2, g2, be2 = raw
    D = wq.shape[0]
    dk = D // n_heads
    wqkv = jnp.concatenate([wq / math.sqrt(dk), wk, wv],
                           axis=1).astype(jnp.bfloat16)
    return (wqkv, wo.astype(jnp.bfloat16), g1, be1,
            w1.astype(jnp.bfloat16), b1,
            w2.astype(jnp.bfloat16), b2, g2, be2)


# --------------------------------- wrapper ------------------------------------
def encoder_layer(x, prepared, *, n_heads):
    """x: (B, N, D) float32 -> (B, N, D) float32."""
    B, N, D = x.shape
    wqkv, wo, g1, be1, w1, b1, w2, b2, g2, be2 = prepared
    x2 = x.reshape(B * N, D)

    # Pass 1: per-batch MHA + residual (grid over batch, parallel axis).
    h = pl.pallas_call(
        functools.partial(mha_residual_kernel, n_heads=n_heads),
        out_shape=jax.ShapeDtypeStruct((B * N, D), jnp.float32),
        grid=(B,),
        in_specs=[
            pl.BlockSpec((N, D), lambda b: (b, 0)),            # x tile
            pl.BlockSpec((D, 3 * D), lambda b: (0, 0)),        # Wqkv (resident)
            pl.BlockSpec((D, D), lambda b: (0, 0)),            # Wo   (resident)
        ],
        out_specs=pl.BlockSpec((N, D), lambda b: (b, 0)),
        compiler_params=pltpu.CompilerParams(
            dimension_semantics=("parallel",)),
    )(x2, wqkv, wo)

    # Pass 2: BN (global B*N statistics) + FFN + BN, whole slab resident.
    vmem = pl.BlockSpec(memory_space=pltpu.MemorySpace.VMEM)
    out = pl.pallas_call(
        bn_ffn_bn_kernel,
        out_shape=jax.ShapeDtypeStruct((B * N, D), jnp.float32),
        in_specs=[vmem] * 9,
        out_specs=vmem,
    )(h, g1, be1, w1, b1, w2, b2, g2, be2)
    return out.reshape(B, N, D)


# ----------------------------- pure-JAX reference -----------------------------
def encoder_layer_ref(x, params, *, n_heads):
    (wq, wk, wv, wo, g1, be1, w1, b1, w2, b2, g2, be2) = params
    B, N, D = x.shape
    dk = D // n_heads
    eps = 1e-5

    q = x @ wq
    k = x @ wk
    v = x @ wv
    q = q.reshape(B, N, n_heads, dk).transpose(0, 2, 1, 3)
    k = k.reshape(B, N, n_heads, dk).transpose(0, 2, 1, 3)
    v = v.reshape(B, N, n_heads, dk).transpose(0, 2, 1, 3)
    s = jnp.einsum("bhnd,bhmd->bhnm", q, k) / math.sqrt(dk)
    p = jax.nn.softmax(s, axis=-1)
    h = jnp.einsum("bhnm,bhmd->bhnd", p, v)
    h = h.transpose(0, 2, 1, 3).reshape(B, N, D)
    mha = h @ wo

    def bn(y, g, b):
        yf = y.reshape(-1, D)
        m = jnp.mean(yf, axis=0, keepdims=True)
        var = jnp.mean((yf - m) ** 2, axis=0, keepdims=True)
        return ((yf - m) / jnp.sqrt(var + eps) * g + b).reshape(B, N, D)

    h1 = bn(x + mha, g1, be1)
    ff = jnp.maximum(h1.reshape(-1, D) @ w1 + b1, 0.0) @ w2 + b2
    h2 = bn(h1 + ff.reshape(B, N, D), g2, be2)
    return h2


# ----------------------------------- main --------------------------------------
if __name__ == "__main__":
    # (batch, n_nodes, embed_dim) — small shapes consistent with forward()
    B, N, D = 2, 8, 32
    N_HEADS = 4
    FF_HIDDEN = 64

    key = jax.random.PRNGKey(0)
    ks = jax.random.split(key, 8)

    x = jax.random.normal(ks[0], (B, N, D), dtype=jnp.float32)

    def init(k, shape, fan_in):
        bound = 1.0 / math.sqrt(fan_in)
        return jax.random.uniform(k, shape, jnp.float32, -bound, bound)

    def q_bf16(w):  # storage-precision round-trip (weights live in bf16)
        return w.astype(jnp.bfloat16).astype(jnp.float32)

    # MHA projections (no bias), stored as (in, out)
    wq = q_bf16(init(ks[1], (D, D), D))
    wk = q_bf16(init(ks[2], (D, D), D))
    wv = q_bf16(init(ks[3], (D, D), D))
    wo = q_bf16(init(ks[4], (D, D), D))
    # BatchNorm affine params (PyTorch default: weight=1, bias=0)
    g1 = jnp.ones((1, D), jnp.float32)
    be1 = jnp.zeros((1, D), jnp.float32)
    g2 = jnp.ones((1, D), jnp.float32)
    be2 = jnp.zeros((1, D), jnp.float32)
    # Feed-forward Linear layers (with bias), stored as (in, out)
    w1 = q_bf16(init(ks[5], (D, FF_HIDDEN), D))
    b1 = init(ks[6], (1, FF_HIDDEN), D)
    w2 = q_bf16(init(ks[7], (FF_HIDDEN, D), FF_HIDDEN))
    b2 = jnp.zeros((1, D), jnp.float32)

    raw = (wq, wk, wv, wo, g1, be1, w1, b1, w2, b2, g2, be2)
    prepared = prepare_params(raw, n_heads=N_HEADS)

    out = encoder_layer(x, prepared, n_heads=N_HEADS)
    out = jax.block_until_ready(out)

    ref = encoder_layer_ref(x, raw, n_heads=N_HEADS)
    assert out.shape == (B, N, D)
    # bf16 matmul operands (f32 accumulation) -> slightly looser tolerance
    assert jnp.allclose(out, ref, atol=3e-2, rtol=3e-2), "mismatch vs reference"

    print("KERNEL_OK")
</pallas_src>

<mosaic_0001>
module attributes {stable_mosaic.version = 11 : i64} {
  func.func @mha_residual_kernel(%arg0: i32, %arg1: memref<8x32xf32, #tpu.memory_space<vmem>>, %arg2: memref<32x96xbf16, #tpu.memory_space<vmem>>, %arg3: memref<32x32xbf16, #tpu.memory_space<vmem>>, %arg4: memref<8x32xf32, #tpu.memory_space<vmem>>) attributes {dimension_semantics = [#tpu.dimension_semantics<parallel>], iteration_bounds = array<i64: 2>, scalar_prefetch = 0 : i64, scratch_operands = 0 : i64, tpu.core_type = #tpu.core_type<tc>, window_params = [{transform_indices = @transform_0, window_bounds = array<i64: 8, 32>}, {pipeline_mode = #tpu.pipeline_mode<synchronous>, transform_indices = @transform_1, window_bounds = array<i64: 32, 96>}, {pipeline_mode = #tpu.pipeline_mode<synchronous>, transform_indices = @transform_2, window_bounds = array<i64: 32, 32>}, {transform_indices = @transform_3, window_bounds = array<i64: 8, 32>}]} {
    %c0 = arith.constant 0 : index
    %c0_0 = arith.constant 0 : index
    %0 = vector.load %arg1[%c0, %c0_0] : memref<8x32xf32, #tpu.memory_space<vmem>>, vector<8x32xf32>
    %1 = arith.truncf %0 : vector<8x32xf32> to vector<8x32xbf16>
    %c0_1 = arith.constant 0 : index
    %c0_2 = arith.constant 0 : index
    %2 = vector.load %arg2[%c0_1, %c0_2] : memref<32x96xbf16, #tpu.memory_space<vmem>>, vector<32x96xbf16>
    %cst = arith.constant dense<0.000000e+00> : vector<8x96xf32>
    %3 = tpu.matmul %1, %2, %cst {dimension_numbers = #tpu.dot_dimension_numbers<[1], [0], [0], [1], [0, 0, 1, 1], [], []>} : vector<8x32xbf16>, vector<32x96xbf16>, vector<8x96xf32> -> vector<8x96xf32>
    %4 = vector.extract_strided_slice %3 {offsets = [0, 0], sizes = [8, 32], strides = [1, 1]} : vector<8x96xf32> to vector<8x32xf32>
    %5 = vector.extract_strided_slice %3 {offsets = [0, 32], sizes = [8, 32], strides = [1, 1]} : vector<8x96xf32> to vector<8x32xf32>
    %6 = vector.extract_strided_slice %3 {offsets = [0, 64], sizes = [8, 32], strides = [1, 1]} : vector<8x96xf32> to vector<8x32xf32>
    %7 = vector.extract_strided_slice %4 {offsets = [0, 0], sizes = [8, 8], strides = [1, 1]} : vector<8x32xf32> to vector<8x8xf32>
    %8 = arith.truncf %7 : vector<8x8xf32> to vector<8x8xbf16>
    %9 = vector.extract_strided_slice %5 {offsets = [0, 0], sizes = [8, 8], strides = [1, 1]} : vector<8x32xf32> to vector<8x8xf32>
    %10 = arith.truncf %9 : vector<8x8xf32> to vector<8x8xbf16>
    %11 = vector.extract_strided_slice %6 {offsets = [0, 0], sizes = [8, 8], strides = [1, 1]} : vector<8x32xf32> to vector<8x8xf32>
    %12 = arith.truncf %11 : vector<8x8xf32> to vector<8x8xbf16>
    %cst_3 = arith.constant dense<0.000000e+00> : vector<8x8xf32>
    %13 = tpu.matmul %8, %10, %cst_3 {dimension_numbers = #tpu.dot_dimension_numbers<[1], [1], [0], [0], [0, 0, 1, 0], [], []>} : vector<8x8xbf16>, vector<8x8xbf16>, vector<8x8xf32> -> vector<8x8xf32>
    %cst_4 = arith.constant dense<0xFF800000> : vector<8xf32>
    %14 = vector.multi_reduction <maximumf>, %13, %cst_4 [1] : vector<8x8xf32> to vector<8xf32>
    %15 = vector.shape_cast %14 : vector<8xf32> to vector<8x1xf32>
    %16 = vector.broadcast %15 : vector<8x1xf32> to vector<8x8xf32>
    %17 = arith.subf %13, %16 : vector<8x8xf32>
    %18 = math.exp %17 : vector<8x8xf32>
    %cst_5 = arith.constant dense<0.000000e+00> : vector<8xf32>
    %19 = vector.multi_reduction <add>, %18, %cst_5 [1] : vector<8x8xf32> to vector<8xf32>
    %20 = vector.shape_cast %19 : vector<8xf32> to vector<8x1xf32>
    %21 = tpu.reciprocal %20 {approx = true} : vector<8x1xf32> -> vector<8x1xf32>
    %22 = vector.broadcast %21 : vector<8x1xf32> to vector<8x8xf32>
    %23 = arith.mulf %18, %22 : vector<8x8xf32>
    %24 = arith.truncf %23 : vector<8x8xf32> to vector<8x8xbf16>
    %cst_6 = arith.constant dense<0.000000e+00> : vector<8x8xf32>
    %25 = tpu.matmul %24, %12, %cst_6 {dimension_numbers = #tpu.dot_dimension_numbers<[1], [0], [0], [1], [0, 0, 1, 1], [], []>} : vector<8x8xbf16>, vector<8x8xbf16>, vector<8x8xf32> -> vector<8x8xf32>
    %26 = vector.extract_strided_slice %4 {offsets = [0, 8], sizes = [8, 8], strides = [1, 1]} : vector<8x32xf32> to vector<8x8xf32>
    %27 = arith.truncf %26 : vector<8x8xf32> to vector<8x8xbf16>
    %28 = vector.extract_strided_slice %5 {offsets = [0, 8], sizes = [8, 8], strides = [1, 1]} : vector<8x32xf32> to vector<8x8xf32>
    %29 = arith.truncf %28 : vector<8x8xf32> to vector<8x8xbf16>
    %30 = vector.extract_strided_slice %6 {offsets = [0, 8], sizes = [8, 8], strides = [1, 1]} : vector<8x32xf32> to vector<8x8xf32>
    %31 = arith.truncf %30 : vector<8x8xf32> to vector<8x8xbf16>
    %cst_7 = arith.constant dense<0.000000e+00> : vector<8x8xf32>
    %32 = tpu.matmul %27, %29, %cst_7 {dimension_numbers = #tpu.dot_dimension_numbers<[1], [1], [0], [0], [0, 0, 1, 0], [], []>} : vector<8x8xbf16>, vector<8x8xbf16>, vector<8x8xf32> -> vector<8x8xf32>
    %cst_8 = arith.constant dense<0xFF800000> : vector<8xf32>
    %33 = vector.multi_reduction <maximumf>, %32, %cst_8 [1] : vector<8x8xf32> to vector<8xf32>
    %34 = vector.shape_cast %33 : vector<8xf32> to vector<8x1xf32>
    %35 = vector.broadcast %34 : vector<8x1xf32> to vector<8x8xf32>
    %36 = arith.subf %32, %35 : vector<8x8xf32>
    %37 = math.exp %36 : vector<8x8xf32>
    %cst_9 = arith.constant dense<0.000000e+00> : vector<8xf32>
    %38 = vector.multi_reduction <add>, %37, %cst_9 [1] : vector<8x8xf32> to vector<8xf32>
    %39 = vector.shape_cast %38 : vector<8xf32> to vector<8x1xf32>
    %40 = tpu.reciprocal %39 {approx = true} : vector<8x1xf32> -> vector<8x1xf32>
    %41 = vector.broadcast %40 : vector<8x1xf32> to vector<8x8xf32>
    %42 = arith.mulf %37, %41 : vector<8x8xf32>
    %43 = arith.truncf %42 : vector<8x8xf32> to vector<8x8xbf16>
    %cst_10 = arith.constant dense<0.000000e+00> : vector<8x8xf32>
    %44 = tpu.matmul %43, %31, %cst_10 {dimension_numbers = #tpu.dot_dimension_numbers<[1], [0], [0], [1], [0, 0, 1, 1], [], []>} : vector<8x8xbf16>, vector<8x8xbf16>, vector<8x8xf32> -> vector<8x8xf32>
    %45 = vector.extract_strided_slice %4 {offsets = [0, 16], sizes = [8, 8], strides = [1, 1]} : vector<8x32xf32> to vector<8x8xf32>
    %46 = arith.truncf %45 : vector<8x8xf32> to vector<8x8xbf16>
    %47 = vector.extract_strided_slice %5 {offsets = [0, 16], sizes = [8, 8], strides = [1, 1]} : vector<8x32xf32> to vector<8x8xf32>
    %48 = arith.truncf %47 : vector<8x8xf32> to vector<8x8xbf16>
    %49 = vector.extract_strided_slice %6 {offsets = [0, 16], sizes = [8, 8], strides = [1, 1]} : vector<8x32xf32> to vector<8x8xf32>
    %50 = arith.truncf %49 : vector<8x8xf32> to vector<8x8xbf16>
    %cst_11 = arith.constant dense<0.000000e+00> : vector<8x8xf32>
    %51 = tpu.matmul %46, %48, %cst_11 {dimension_numbers = #tpu.dot_dimension_numbers<[1], [1], [0], [0], [0, 0, 1, 0], [], []>} : vector<8x8xbf16>, vector<8x8xbf16>, vector<8x8xf32> -> vector<8x8xf32>
    %cst_12 = arith.constant dense<0xFF800000> : vector<8xf32>
    %52 = vector.multi_reduction <maximumf>, %51, %cst_12 [1] : vector<8x8xf32> to vector<8xf32>
    %53 = vector.shape_cast %52 : vector<8xf32> to vector<8x1xf32>
    %54 = vector.broadcast %53 : vector<8x1xf32> to vector<8x8xf32>
    %55 = arith.subf %51, %54 : vector<8x8xf32>
    %56 = math.exp %55 : vector<8x8xf32>
    %cst_13 = arith.constant dense<0.000000e+00> : vector<8xf32>
    %57 = vector.multi_reduction <add>, %56, %cst_13 [1] : vector<8x8xf32> to vector<8xf32>
    %58 = vector.shape_cast %57 : vector<8xf32> to vector<8x1xf32>
    %59 = tpu.reciprocal %58 {approx = true} : vector<8x1xf32> -> vector<8x1xf32>
    %60 = vector.broadcast %59 : vector<8x1xf32> to vector<8x8xf32>
    %61 = arith.mulf %56, %60 : vector<8x8xf32>
    %62 = arith.truncf %61 : vector<8x8xf32> to vector<8x8xbf16>
    %cst_14 = arith.constant dense<0.000000e+00> : vector<8x8xf32>
    %63 = tpu.matmul %62, %50, %cst_14 {dimension_numbers = #tpu.dot_dimension_numbers<[1], [0], [0], [1], [0, 0, 1, 1], [], []>} : vector<8x8xbf16>, vector<8x8xbf16>, vector<8x8xf32> -> vector<8x8xf32>
    %64 = vector.extract_strided_slice %4 {offsets = [0, 24], sizes = [8, 8], strides = [1, 1]} : vector<8x32xf32> to vector<8x8xf32>
    %65 = arith.truncf %64 : vector<8x8xf32> to vector<8x8xbf16>
    %66 = vector.extract_strided_slice %5 {offsets = [0, 24], sizes = [8, 8], strides = [1, 1]} : vector<8x32xf32> to vector<8x8xf32>
    %67 = arith.truncf %66 : vector<8x8xf32> to vector<8x8xbf16>
    %68 = vector.extract_strided_slice %6 {offsets = [0, 24], sizes = [8, 8], strides = [1, 1]} : vector<8x32xf32> to vector<8x8xf32>
    %69 = arith.truncf %68 : vector<8x8xf32> to vector<8x8xbf16>
    %cst_15 = arith.constant dense<0.000000e+00> : vector<8x8xf32>
    %70 = tpu.matmul %65, %67, %cst_15 {dimension_numbers = #tpu.dot_dimension_numbers<[1], [1], [0], [0], [0, 0, 1, 0], [], []>} : vector<8x8xbf16>, vector<8x8xbf16>, vector<8x8xf32> -> vector<8x8xf32>
    %cst_16 = arith.constant dense<0xFF800000> : vector<8xf32>
    %71 = vector.multi_reduction <maximumf>, %70, %cst_16 [1] : vector<8x8xf32> to vector<8xf32>
    %72 = vector.shape_cast %71 : vector<8xf32> to vector<8x1xf32>
    %73 = vector.broadcast %72 : vector<8x1xf32> to vector<8x8xf32>
    %74 = arith.subf %70, %73 : vector<8x8xf32>
    %75 = math.exp %74 : vector<8x8xf32>
    %cst_17 = arith.constant dense<0.000000e+00> : vector<8xf32>
    %76 = vector.multi_reduction <add>, %75, %cst_17 [1] : vector<8x8xf32> to vector<8xf32>
    %77 = vector.shape_cast %76 : vector<8xf32> to vector<8x1xf32>
    %78 = tpu.reciprocal %77 {approx = true} : vector<8x1xf32> -> vector<8x1xf32>
    %79 = vector.broadcast %78 : vector<8x1xf32> to vector<8x8xf32>
    %80 = arith.mulf %75, %79 : vector<8x8xf32>
    %81 = arith.truncf %80 : vector<8x8xf32> to vector<8x8xbf16>
    %cst_18 = arith.constant dense<0.000000e+00> : vector<8x8xf32>
    %82 = tpu.matmul %81, %69, %cst_18 {dimension_numbers = #tpu.dot_dimension_numbers<[1], [0], [0], [1], [0, 0, 1, 1], [], []>} : vector<8x8xbf16>, vector<8x8xbf16>, vector<8x8xf32> -> vector<8x8xf32>
    %83 = tpu.concatenate %25, %44, %63, %82 in 1 : vector<8x8xf32>, vector<8x8xf32>, vector<8x8xf32>, vector<8x8xf32> -> vector<8x32xf32>
    %84 = arith.truncf %83 : vector<8x32xf32> to vector<8x32xbf16>
    %c0_19 = arith.constant 0 : index
    %c0_20 = arith.constant 0 : index
    %85 = vector.load %arg3[%c0_19, %c0_20] : memref<32x32xbf16, #tpu.memory_space<vmem>>, vector<32x32xbf16>
    %cst_21 = arith.constant dense<0.000000e+00> : vector<8x32xf32>
    %86 = tpu.matmul %84, %85, %cst_21 {dimension_numbers = #tpu.dot_dimension_numbers<[1], [0], [0], [1], [0, 0, 1, 1], [], []>} : vector<8x32xbf16>, vector<32x32xbf16>, vector<8x32xf32> -> vector<8x32xf32>
    %87 = arith.addf %0, %86 : vector<8x32xf32>
    %c0_22 = arith.constant 0 : index
    %c0_23 = arith.constant 0 : index
    %88 = vector.load %arg4[%c0_22, %c0_23] : memref<8x32xf32, #tpu.memory_space<vmem>>, vector<8x32xf32>
    tpu.vector_store %arg4[%c0_22, %c0_23], %87 {strides = array<i32>} : memref<8x32xf32, #tpu.memory_space<vmem>>, vector<8x32xf32>,
    return
  }
  func.func @transform_0(%arg0: i32) -> (i32, i32) {
    %c0_i32 = arith.constant 0 : i32
    %c0_i32_0 = arith.constant 0 : i32
    return %arg0, %c0_i32 : i32, i32
  }
  func.func @transform_1(%arg0: i32) -> (i32, i32) {
    %c0_i32 = arith.constant 0 : i32
    %c0_i32_0 = arith.constant 0 : i32
    %c0_i32_1 = arith.constant 0 : i32
    return %c0_i32, %c0_i32_0 : i32, i32
  }
  func.func @transform_2(%arg0: i32) -> (i32, i32) {
    %c0_i32 = arith.constant 0 : i32
    %c0_i32_0 = arith.constant 0 : i32
    %c0_i32_1 = arith.constant 0 : i32
    return %c0_i32, %c0_i32_0 : i32, i32
  }
  func.func @transform_3(%arg0: i32) -> (i32, i32) {
    %c0_i32 = arith.constant 0 : i32
    %c0_i32_0 = arith.constant 0 : i32
    return %arg0, %c0_i32 : i32, i32
  }
}

</mosaic_0001>

<bundles_post_ra>
// kernel: tpu_custom_call.1
= control target key start
LH: loop header
LB: loop body
LE: loop exit
PB: predicated region body
PF: predicated region fallthrough
CT: control target
= control target key end

     0   :  { %8 = vsyncpa [#allocation3], 0  ;;  %s1635_s0 = inlined_call_operand.hbm [shape: f32[16,32], index: 0, kind: input, shape index: {}]   ;;  %s1636_s1 = inlined_call_operand.hbm [shape: bf16[32,96], index: 1, kind: input, shape index: {}]   ;;  %s1637_s2 = inlined_call_operand.hbm [shape: bf16[32,32], index: 2, kind: input, shape index: {}]   ;;  %s1638_s3 = inlined_call_operand.hbm [shape: f32[16,32], index: 3, kind: output, shape index: {}]  }
   0x1   :  { %10 = vsyncpa [#allocation3 + $0x1], 0 }
   0x2   :  { %11 = vsyncpa [#allocation6], 0 }
   0x3   :  { %12 = vsyncpa [#allocation4], 0 }
   0x4   :  { %14 = vsyncpa [#allocation4 + $0x1], 0  ;;  %s1323_s12 = smov 0   ;;  %s1325_s13 = smov 0  }
   0x5   :  { %s1327_s14 = smov 0   ;;  %s1329_s15 = smov 0  }
   0x6 LB: > { %s1344_s16 = sadd.s32 4294967295, %s1279_s15   ;;  %s902_s17 = sadd.s32 4294967294, %s1279_s15   ;;  %s1279_s15 = sphi %s1329_s15, %s1658_s15   ;;  %s1275_s14 = sphi %s1327_s14, %s1657_s14   ;;  %s1271_s13 = sphi %s1325_s13, %s1656_s13   ;;  %s1267_s12 = sphi %s1323_s12, %s1655_s12  }
   0x7   : > { %p40_p0 = scmp.ne.s32.totalorder %s1271_s13, %s1267_s12  ;;  %p1639_p1 = scmp.eq.s32.totalorder %s1344_s16, 0 }
   0x8   : > { %p112_p3 = scmp.eq.s32.totalorder %s902_s17, 1  ;;  %p903_p5 = scmp.ge.s32.totalorder %s1279_s15, 1 }
   0x9   : > { %p1353_p4 = por %p1639_p1, %p40_p0  ;;  %p119_p7 = scmp.lt.s32.totalorder %s1279_s15, 3 }
   0xa   : > { %p1358_p6 = por %p112_p3, %p40_p0  ;;  %s1281_s21 = smov [#allocation5]  }
   0xb   : > { %s1642_s18 = scalar_select %p1353_p4, 1, 0 }
   0xc   : > { %s1643_s19 = scalar_select %p1358_p6, 1, 0 }
   0xd   : > { %p1363_p8 = pnand %p903_p5, %p119_p7  ;;  %s131_s22 = sshll.u32 %s1281_s21, 4  ;;  %s1367_s22 = int_to_ptr.vmem [resolvable:$true] %s131_s22 }
   0xe   : > { %s1282_s24 = smov [#allocation7]   ;;  %s1123_s28 = scalar_lea.hbm %s1636_s1, 256 }
   0xf   : > { %p1030_p9 = pneg %p1363_p8  ;;  %s144_s25 = sshll.u32 %s1282_s24, 4  ;;  %s1378_s25 = int_to_ptr.vmem [resolvable:$true] %s144_s25 }
  0x10   : > { %p1124_p12 = scmp.ne.s32.totalorder %s1636_s1, %s1123_s28  ;;  %p1130_p5 = scmp.lt.u32.totalorder %s1123_s28, %s1636_s1 }
  0x11   : > { %p1374_p11 = pnand %p1030_p9, %p1639_p1 }
  0x13   : > { %p1125_p13 = pneg %p1374_p11 }
  0x15   : > { %p1126_p0 = pnand %p1125_p13, %p1124_p12 }
  0x17   : > { %p1127_p3 = pneg %p1126_p0 }
  0x19   : > { %p1132_p7 = pnand %p1130_p5, %p1127_p3 }
  0x1b   : > { %1135 = shalt.err (!%p1132_p7)
}
  0x1c   : > { %s1136_s6 = scalar_lea.vmem %s1367_s22, 256  ;;  %p1144_p2 = scmp.lt.s32.totalorder %s1367_s22, %s1367_s22 }
  0x1d   : > { %p1137_p9 = scmp.ne.s32.totalorder %s1367_s22, %s1136_s6  ;;  %p1145_p12 = scmp.lt.s32.totalorder %s1136_s6, %s1136_s6 }
  0x1f   : > { %p1139_p10 = pnand %p1137_p9, %p1125_p13  ;;  %p1146_p0 = por %p1145_p12, %p1144_p2 }
  0x21   : > { %p1140_p1 = pneg %p1139_p10 }
  0x23   : > { %p1147_p6 = pnand %p1146_p0, %p1140_p1 }
  0x25   : > { %1150 = shalt.err (!%p1147_p6)
}
  0x26   : > { %s1283_s7 = smov 64   ;;  %s1284_s8 = smov 4  }
  0x27   : > { %1033 = dma.hbm_to_vmem [thread:$0]  (!%p1374_p11), %s1636_s1, 256, %s1367_s22, [#allocation6], %s1283_s7, %s1283_s7, %s1284_s8  }
  0x28   : > { %s1151_s21 = scalar_lea.hbm %s1637_s2, 256 }
  0x29   : > { %p1152_p2 = scmp.ne.s32.totalorder %s1637_s2, %s1151_s21  ;;  %p1158_p10 = scmp.lt.u32.totalorder %s1151_s21, %s1637_s2 }
  0x2b   : > { %p1154_p1 = pnand %p1152_p2, %p1125_p13 }
  0x2d   : > { %p1155_p6 = pneg %p1154_p1 }
  0x2f   : > { %p1160_p3 = pnand %p1158_p10, %p1155_p6 }
  0x31   : > { %1163 = shalt.err (!%p1160_p3)
}
  0x32   : > { %s1164_s22 = scalar_lea.vmem %s1378_s25, 256  ;;  %p1172_p12 = scmp.lt.s32.totalorder %s1378_s25, %s1378_s25 }
  0x33   : > { %p1165_p5 = scmp.ne.s32.totalorder %s1378_s25, %s1164_s22  ;;  %p1173_p0 = scmp.lt.s32.totalorder %s1164_s22, %s1164_s22 }
  0x35   : > { %p1167_p7 = pnand %p1165_p5, %p1125_p13  ;;  %p1174_p2 = por %p1173_p0, %p1172_p12 }
  0x37   : > { %p1168_p9 = pneg %p1167_p7 }
  0x39   : > { %p1175_p1 = pnand %p1174_p2, %p1168_p9 }
  0x3b   : > { %1178 = shalt.err (!%p1175_p1)
}
  0x3c   : > { %1036 = dma.hbm_to_vmem [thread:$0]  (!%p1374_p11), %s1637_s2, 256, %s1378_s25, [#allocation6], %s1283_s7, %s1283_s7, %s1284_s8  }
  0x3d   : > { %s1433_s4 = sadd.s32 1, %s1279_s15   ;;  %s27_s23 = sadd.s32 1, %s1275_s14 }
  0x3e   : > { %s24_s5 = ssub.s32 %s1279_s15, %s1433_s4  ;;  %p34_p13 = scmp.ne.s32.totalorder %s1275_s14, %s1271_s13 }
  0x3f   : > { %p25_p6 = scmp.eq.s32.totalorder %s24_s5, 0  ;;  %p35_p10 = scmp.eq.s32.totalorder %s1279_s15, 0 }
  0x40   : > { %p1646_p3 = scmp.eq.s32.totalorder %s1344_s16, 1  ;;  %p1047_p7 = scmp.lt.s32.totalorder %s1279_s15, 2 }
  0x41   : > { %s1449_s9 = scalar_select %p25_p6, %s1275_s14, %s27_s23  }
  0x42   : > { %p1443_p5 = por %p1646_p3, %p34_p13  ;;  %p36_p9 = por %p35_p10, %p34_p13 }
  0x43   : > { %s158_s10 = sand.u32 1, %s1275_s14   ;;  %s908_s25 = sshll.u32 %s1279_s15, 7 }
  0x44   : > { %s1647_s6 = scalar_select %p1443_p5, 1, 0 }
  0x45   : > { %s907_s11 = sshll.u32 %s158_s10, 3  ;;  %s1456_s17 = scalar_lea.hbm %s1635_s0, %s908_s25 }
  0x46   : > { %s162_s21 = scalar_lea.vmem [#allocation2], %s907_s11  ;;  %p1460_p11 = pnand %p1047_p7, %p36_p9 }
  0x47   : > { %s169_s24 = sshll.u32 %s162_s21, 4  ;;  %s159_s27 = scalar_lea.sflag [#allocation3], %s158_s10  ;;  %s1458_s24 = int_to_ptr.vmem [resolvable:$true] %s169_s24 }
  0x48   : > { %s1179_s28 = scalar_lea.hbm %s1456_s17, 128  ;;  %p1181_p0 = pneg %p1460_p11 }
  0x49   : > { %p1180_p12 = scmp.ne.s32.totalorder %s1456_s17, %s1179_s28  ;;  %s1184_s30 = scalar_lea.hbm %s1635_s0, 256 }
  0x4a   : > { %p1185_p13 = scmp.lt.u32.totalorder %s1456_s17, %s1635_s0  ;;  %p1186_p6 = scmp.lt.u32.totalorder %s1184_s30, %s1179_s28 }
  0x4b   : > { %p1182_p2 = pnand %p1181_p0, %p1180_p12  ;;  %p1188_p3 = scmp.lt.u32.totalorder %s1179_s28, %s1456_s17 }
  0x4c   : > { %p1187_p10 = por %p1186_p6, %p1185_p13 }
  0x4d   : > { %p1183_p1 = pneg %p1182_p2 }
  0x4e   : > { %p1189_p7 = por %p1188_p3, %p1187_p10 }
  0x50   : > { %p1190_p9 = pnand %p1189_p7, %p1183_p1 }
  0x52   : > { %1193 = shalt.err (!%p1190_p9)
}
  0x53   : > { %s1194_s10 = scalar_lea.vmem %s1458_s24, 128  ;;  %s1285_s11 = smov [#allocation2]  }
  0x54   : > { %p1195_p12 = scmp.ne.s32.totalorder %s1458_s24, %s1194_s10  ;;  %s1199_s25 = sshll.u32 %s1285_s11, 4  ;;  %s1200_s25 = int_to_ptr.vmem [resolvable:$false] %s1199_s25 }
  0x55   : > { %s1201_s7 = scalar_lea.vmem %s1200_s25, 256  ;;  %p1202_p4 = scmp.lt.s32.totalorder %s1458_s24, %s1200_s25 }
  0x56   : > { %p1197_p2 = pnand %p1195_p12, %p1181_p0  ;;  %p1203_p13 = scmp.lt.s32.totalorder %s1201_s7, %s1194_s10 }
  0x58   : > { %p1198_p5 = pneg %p1197_p2  ;;  %p1204_p6 = por %p1203_p13, %p1202_p4 }
  0x5a   : > { %p1205_p10 = pnand %p1204_p6, %p1198_p5 }
  0x5c   : > { %1208 = shalt.err (!%p1205_p10)
}
  0x5d   : > { %1040 = dma.hbm_to_vmem [thread:$0]  (!%p1460_p11), %s1456_s17, 128, %s1458_s24, %s159_s27  }
  0x5e   : > { %178 = sbr.rel (%p1363_p8) target bundleno = 1600 (0x640), region = 32  ;;  %s1492_s8 = sand.u32 (!%p1363_p8), 1, %s1271_s13  }
  0x5f   : > { %s910_s21 = sshll.u32 (!%p1363_p8), %s1492_s8, 3  ;;  %s181_s28 = scalar_lea.sflag (!%p1363_p8), [#allocation3], %s1492_s8 }
  0x60   : > { %s184_s22 = scalar_lea.vmem (!%p1363_p8), [#allocation2], %s910_s21  ;;  %p1649_p4 = scmp.ne.s32.totalorder (!%p1363_p8), %s1642_s18, 0 }
  0x65   : > { %1254 = dma.done.wait (%p1649_p4), %s181_s28, 128  }
  0x66   : > { %1256 = vsyncadd (%p1649_p4), %s181_s28, 4294967168  ;;  %p1650_p5 = scmp.eq.s32.totalorder %s1344_s16, 0 }
  0x68   : > { %1258 = dma.done.wait (%p1650_p5), [#allocation6], 512   ;;  %p1651_p8 = pmov %p1650_p5 }
  0x69   : > { %v1286_v0 = vmov 0.0   ;;  %vm1287_vm0 = vmmov 0   ;;  %v1103_v1 = vld [vmem:[#allocation5] sm:$0xff]   ;;  %v1104_v2 = vld [vmem:[#allocation5 + $0x8] sm:$0xff]   ;;  %v1512_v3 = vld [vmem:[%s184_s22] sm:$0xff]  ;;  %vm234_vm1 = vcmask 261120  }
  0x6a   : > { %1260 = vsyncadd (%p1651_p8), [#allocation6], 4294966784  ;;  %954 = vmatprep.subr.bf16.mxu0 %v1286_v0  ;;  %958 = vmatprep.mubr.msk.bf16.mxu0 %vm1287_vm0, %v1286_v0  ;;  %v217_v4 = vpack.c.bf16 %v1512_v3, %v1512_v3  ;;  %s1288_s18 = smov 120   ;;  %s1289_s20 = smov 96   ;;  %vm282_vm2 = vcmask 64512   ;;  %vm346_vm3 = vcmask 1043456  }
  0x6b   : > { %962 = vmatprep.subr.bf16.mxu1 %v1286_v0  ;;  %964 = vmatprep.mubr.msk.bf16.mxu1 %vm1287_vm0, %v1286_v0  ;;  %s1290_s17 = smov 80   ;;  %s1291_s24 = smov 88   ;;  %vm733_vm4 = vcmask 130048   ;;  %vm735_vm5 = vcmask 195584  }
  0x6c   : > { %955 = vmatpush3.bf16.msra.mxu0 %v1103_v1  ;;  %s1292_s26 = smov 72   ;;  %s1293_s27 = smov 112  }
  0x6d   : > { %956 = vmatprep.subr.bf16.mxu0 %v1286_v0  ;;  %s1294_s29 = smov 104   ;;  %s1295_s30 = smov 56  }
  0x6e   : > { %s1296_s23 = smov 64   ;;  %s1297_s5 = smov 40  }
  0x6f   : > { %s1298_s10 = smov 48   ;;  %s1299_s11 = smov 8  }
  0x70   : > { %957 = vmatpush3.bf16.msra.mxu0 %v1104_v2  ;;  %s1300_s25 = smov 16   ;;  %s1301_s7 = smov 24  }
  0x71   : > { %968 = vmatprep.subr.bf16.mxu0 %v1286_v0  ;;  %s929_s28 = sshll.u32 %s1344_s16, 7  ;;  %s214_s22 = scalar_lea.vmem [#allocation8], %s910_s21 }
  0x72   : > { %s800_s16 = scalar_lea.sflag [#allocation4], %s1492_s8  ;;  %p1652_p0 = scmp.ne.s32.totalorder %s1647_s6, 0 }
  0x73   : > { %959 = vmatmul.mubr.msk.bf16.vlgmr.msra.gmra.mrb[0].mxu0 %vm234_vm1, %v217_v4 }
  0x74   : > { %970 = vmatprep.mubr.msk.bf16.mxu0 %vm1287_vm0, %v1286_v0 }
 0x146   : > { %v272_v5 = vpop.f32.mrb[0].mxu0 }
 0x147   : > { %v1521_v6 = vpack.c.bf16 %v272_v5, %v272_v5  ;;  %v960_v7 = vpop.f32.mrb[1].mxu0 }
 0x148   : > { %v275_v8 = vpop.f32.mrb[2].mxu0 }
 0x149   : > { %390 = vrot.lane.b32.xlu1 %v1521_v6, %s1288_s18  ;;  %280 = vrot.lane.b32.xlu0 %v1521_v6, %s1289_s20  ;;  %v961_v9 = vpop.f32.mrb[3].mxu0  ;;  %s813_s18 = sshll.u32 %s214_s22, 4  ;;  %s1592_s18 = int_to_ptr.vmem [resolvable:$true] %s813_s18 }
 0x14a   : > { %s1209_s21 = scalar_lea.vmem %s1592_s18, 128 }
 0x14b   : > { %p1210_p11 = scmp.ne.s32.totalorder %s1592_s18, %s1209_s21 }
 0x14d   : > { %502 = vrot.lane.b32.xlu1 %v1521_v6, %s1290_s17  ;;  %392 = vrot.lane.b32.xlu0 %v1521_v6, %s1291_s24  ;;  %s1590_s24 = scalar_lea.hbm %s1638_s3, %s929_s28  ;;  %p1211_p1 = pnand %p1210_p11, %p1652_p0 }
 0x14f   : > { %p1212_p3 = pneg %p1211_p1 }
 0x151   : > { %612 = vrot.lane.b32.xlu1 %v1521_v6, %s1292_s26  ;;  %500 = vrot.lane.b32.xlu0 %v1521_v6, %s1293_s27  ;;  %s1302_s26 = smov [#allocation8]  }
 0x152   : > { %s1213_s27 = sshll.u32 %s1302_s26, 4  ;;  %s1214_s27 = int_to_ptr.vmem [resolvable:$false] %s1213_s27 }
 0x153   : > { %p1216_p7 = scmp.lt.s32.totalorder %s1592_s18, %s1214_s27 }
 0x155   : > { %610 = vrot.lane.b32.xlu0 %v1521_v6, %s1294_s29  ;;  %s1215_s29 = scalar_lea.vmem %s1214_s27, 256 }
 0x156   : > { %p1217_p9 = scmp.lt.s32.totalorder %s1215_s29, %s1209_s21 }
 0x158   : > { %p1218_p12 = por %p1217_p9, %p1216_p7 }
 0x15a   : > { %p1219_p2 = pnand %p1218_p12, %p1212_p3 }
 0x1bb   : > { %v281_v10 = vpop.permute.xlu0 %280  ;;  %v391_v13 = vpop.permute.xlu1 %390 }
 0x1bc   : > { %v287_v11 = vsel %vm282_vm2, %v281_v10, 0 }
 0x1bd   : > { %963 = vmatpush3.bf16.xpose.msra.mxu1 %v287_v11 }
 0x1be   : > { %974 = vmatprep.subr.bf16.mxu1 %v1286_v0 }
 0x1bf   : > { %v393_v12 = vpop.permute.xlu0 %392  ;;  %v503_v15 = vpop.permute.xlu1 %502 }
 0x1c0   : > { %v398_v14 = vsel %vm282_vm2, %v393_v12, 0  ;;  %v508_v16 = vsel %vm282_vm2, %v503_v15, 0 }
 0x1c3   : > { %v613_v17 = vpop.permute.xlu1 %612  ;;  %v501_v18 = vpop.permute.xlu0 %500 }
 0x1c4   : > { %965 = vmatmul.mubr.msk.bf16.vlgmr.msra.gmra.mrb[0].mxu1 %vm282_vm2, %v1521_v6  ;;  %v618_v19 = vsel %vm282_vm2, %v613_v17, 0 }
 0x1c5   : > { %975 = vmatpush3.bf16.xpose.msra.mxu1 %v398_v14  ;;  %976 = vmatprep.mubr.msk.bf16.mxu1 %vm1287_vm0, %v1286_v0 }
 0x1c6   : > { %986 = vmatprep.subr.bf16.mxu1 %v1286_v0 }
 0x1c7   : > { %v611_v20 = vpop.permute.xlu0 %610 }
 0x1cc   : > { %977 = vmatmul.mubr.msk.bf16.vlgmr.msra.gmra.mrb[4].mxu1 %vm282_vm2, %v391_v13 }
 0x1cd   : > { %987 = vmatpush3.bf16.xpose.msra.mxu1 %v508_v16  ;;  %988 = vmatprep.mubr.msk.bf16.mxu1 %vm1287_vm0, %v1286_v0 }
 0x1ce   : > { %998 = vmatprep.subr.bf16.mxu1 %v1286_v0 }
 0x1d4   : > { %989 = vmatmul.mubr.msk.bf16.vlgmr.msra.gmra.mrb[8].mxu1 %vm282_vm2, %v501_v18 }
 0x1d5   : > { %999 = vmatpush3.bf16.xpose.msra.mxu1 %v618_v19  ;;  %1000 = vmatprep.mubr.msk.bf16.mxu1 %vm1287_vm0, %v1286_v0 }
 0x1d6   : > { %1010 = vmatprep.subr.bf16.mxu1 %v1286_v0 }
 0x1dc   : > { %1001 = vmatmul.mubr.msk.bf16.vlgmr.msra.gmra.mrb[12].mxu1 %vm282_vm2, %v611_v20 }
 0x1dd   : > { %1014 = vmatprep.mubr.msk.bf16.mxu1 %vm1287_vm0, %v1286_v0 }
 0x297   : > { %v323_v21 = vpop.f32.mrb[0].mxu1 }
 0x298   : > { %v966_v22 = vpop.f32.mrb[1].mxu1  ;;  %v329_v23 = vsel %vm282_vm2, %v323_v21, -inf }
 0x299   : > { %330 = vmax.xlane.f32.xlu1 %v329_v23  ;;  %v326_v24 = vpop.f32.mrb[2].mxu1 }
 0x29a   : > { %v967_v25 = vpop.f32.mrb[3].mxu1 }
 0x29f   : > { %v434_v26 = vpop.f32.mrb[4].mxu1 }
 0x2a0   : > { %v978_v27 = vpop.f32.mrb[5].mxu1  ;;  %v440_v28 = vsel %vm282_vm2, %v434_v26, -inf }
 0x2a1   : > { %441 = vmax.xlane.f32.xlu0 %v440_v28  ;;  %v437_v29 = vpop.f32.mrb[6].mxu1 }
 0x2a2   : > { %v979_v30 = vpop.f32.mrb[7].mxu1 }
 0x2a7   : > { %v544_v31 = vpop.f32.mrb[8].mxu1 }
 0x2a8   : > { %v990_v32 = vpop.f32.mrb[9].mxu1  ;;  %v550_v33 = vsel %vm282_vm2, %v544_v31, -inf }
 0x2a9   : > { %551 = vmax.xlane.f32.xlu0 %v550_v33  ;;  %v547_v34 = vpop.f32.mrb[10].mxu1  ;;  %v1106_v32 = vld [vmem:[#allocation7 + $0x8] sm:$0xff]  }
 0x2aa   : > { %v991_v35 = vpop.f32.mrb[11].mxu1 }
 0x2af   : > { %v654_v36 = vpop.f32.mrb[12].mxu1 }
 0x2b0   : > { %v1002_v37 = vpop.f32.mrb[13].mxu1  ;;  %v660_v38 = vsel %vm282_vm2, %v654_v36, -inf }
 0x2b1   : > { %661 = vmax.xlane.f32.xlu1 %v660_v38  ;;  %v657_v39 = vpop.f32.mrb[14].mxu1 }
 0x2b2   : > { %v1003_v40 = vpop.f32.mrb[15].mxu1 }
 0x326   : > { %v331_v41 = vpop.xlane.xlu1 %330 }
 0x327   : > { %v332_v42 = vsub.f32 %v323_v21, %v331_v41 }
 0x329   : > { %v333_v43 = vmul.f32 1.442695, %v332_v42 }
 0x32b   : > { %1107 = vpow2.f32 %v333_v43 }
 0x32e   : > { %v442_v44 = vpop.xlane.xlu0 %441 }
 0x32f   : > { %v443_v45 = vsub.f32 %v434_v26, %v442_v44 }
 0x331   : > { %v444_v46 = vmul.f32 1.442695, %v443_v45 }
 0x333   : > { %1109 = vpow2.f32 %v444_v46 }
 0x335   : > { %v1108_v47 = vpop.eup %1107 }
 0x336   : > { %v552_v48 = vpop.xlane.xlu0 %551  ;;  %v335_v49 = vsel %vm282_vm2, %v1108_v47, 0.0 }
 0x337   : > { %v553_v50 = vsub.f32 %v544_v31, %v552_v48  ;;  %336 = vadd.xlane.f32.xlu0 %v335_v49  ;;  %v1105_v31 = vld [vmem:[#allocation7] sm:$0xff]  }
 0x338   : > { %1011 = vmatpush3.bf16.msra.mxu1 %v1105_v31 }
 0x339   : > { %v554_v51 = vmul.f32 1.442695, %v553_v50  ;;  %1012 = vmatprep.subr.bf16.mxu1 %v1286_v0 }
 0x33b   : > { %1111 = vpow2.f32 %v554_v51 }
 0x33c   : > { %1013 = vmatpush3.bf16.msra.mxu1 %v1106_v32 }
 0x33d   : > { %v1110_v52 = vpop.eup %1109 }
 0x33e   : > { %v446_v53 = vsel %vm282_vm2, %v1110_v52, 0.0  ;;  %v662_v56 = vpop.xlane.xlu1 %661 }
 0x33f   : > { %447 = vadd.xlane.f32.xlu1 %v446_v53  ;;  %v663_v57 = vsub.f32 %v654_v36, %v662_v56 }
 0x341   : > { %v664_v58 = vmul.f32 1.442695, %v663_v57 }
 0x343   : > { %1113 = vpow2.f32 %v664_v58 }
 0x345   : > { %v1112_v54 = vpop.eup %1111 }
 0x346   : > { %v556_v55 = vsel %vm282_vm2, %v1112_v54, 0.0 }
 0x347   : > { %557 = vadd.xlane.f32.xlu0 %v556_v55 }
 0x34d   : > { %v1114_v59 = vpop.eup %1113 }
 0x34e   : > { %v666_v60 = vsel %vm282_vm2, %v1114_v59, 0.0 }
 0x350   : > { %452 = vrot.lane.b32.xlu1 %v1521_v6, %s1295_s30 }
 0x35d   : > { %341 = vrot.lane.b32.xlu0 %v1521_v6, %s1296_s23 }
 0x361   : > { %672 = vrot.lane.b32.xlu0 %v1521_v6, %s1297_s5 }
 0x374   : > { %667 = vadd.xlane.f32.xlu1 %v666_v60 }
 0x385   : > { %562 = vrot.lane.b32.xlu1 %v1521_v6, %s1298_s10 }
 0x3c4   : > { %v337_v61 = vpop.xlane.xlu0 %336 }
 0x3c5   : > { %1115 = vrcp.f32 %v337_v61 }
 0x3cc   : > { %v448_v62 = vpop.xlane.xlu1 %447 }
 0x3cd   : > { %1117 = vrcp.f32 %v448_v62 }
 0x3cf   : > { %v1116_v63 = vpop.eup %1115 }
 0x3d0   : > { %v339_v2 = vmul.f32 %v1116_v63, %v1108_v47  ;;  %v453_v7 = vpop.permute.xlu1 %452 }
 0x3d1   : > { %v458_v10 = vsel %vm346_vm3, %v453_v7, 0 }
 0x3d2   : > { %v340_v8 = vpack.c.bf16 %v339_v2, %v339_v2 }
 0x3d4   : > { %v558_v1 = vpop.xlane.xlu0 %557 }
 0x3d5   : > { %1119 = vrcp.f32 %v558_v1 }
 0x3d7   : > { %v1118_v9 = vpop.eup %1117 }
 0x3d8   : > { %v342_v4 = vpop.permute.xlu0 %341  ;;  %v450_v6 = vmul.f32 %v1118_v9, %v1110_v52 }
 0x3d9   : > { %v348_v5 = vsel %vm346_vm3, %v342_v4, 0 }
 0x3da   : > { %969 = vmatpush3.bf16.msra.mxu0 %v348_v5  ;;  %v451_v11 = vpack.c.bf16 %v450_v6, %v450_v6 }
 0x3db   : > { %980 = vmatprep.subr.bf16.mxu0 %v1286_v0 }
 0x3dc   : > { %v673_v17 = vpop.permute.xlu0 %672 }
 0x3dd   : > { %971 = vmatmul.mubr.msk.bf16.vlgmr.msra.gmra.mrb[4].mxu0 %vm282_vm2, %v340_v8  ;;  %v678_v19 = vsel %vm346_vm3, %v673_v17, 0 }
 0x3de   : > { %981 = vmatpush3.bf16.msra.mxu0 %v458_v10  ;;  %982 = vmatprep.mubr.msk.bf16.mxu0 %vm1287_vm0, %v1286_v0 }
 0x3df   : > { %992 = vmatprep.subr.bf16.mxu0 %v1286_v0  ;;  %v1120_v12 = vpop.eup %1119 }
 0x3e0   : > { %v560_v14 = vmul.f32 %v1120_v12, %v1112_v54 }
 0x3e2   : > { %v561_v18 = vpack.c.bf16 %v560_v14, %v560_v14 }
 0x3e5   : > { %983 = vmatmul.mubr.msk.bf16.vlgmr.msra.gmra.mrb[8].mxu0 %vm282_vm2, %v451_v11 }
 0x3e6   : > { %994 = vmatprep.mubr.msk.bf16.mxu0 %vm1287_vm0, %v1286_v0 }
 0x401   : > { %v668_v13 = vpop.xlane.xlu1 %667 }
 0x402   : > { %1121 = vrcp.f32 %v668_v13 }
 0x405   : > { %v563_v15 = vpop.permute.xlu1 %562 }
 0x406   : > { %v568_v16 = vsel %vm346_vm3, %v563_v15, 0 }
 0x407   : > { %993 = vmatpush3.bf16.msra.mxu0 %v568_v16 }
 0x408   : > { %1004 = vmatprep.subr.bf16.mxu0 %v1286_v0 }
 0x40a   : > { %995 = vmatmul.mubr.msk.bf16.vlgmr.msra.gmra.mrb[12].mxu0 %vm282_vm2, %v561_v18 }
 0x40b   : > { %1005 = vmatpush3.bf16.msra.mxu0 %v678_v19  ;;  %1006 = vmatprep.mubr.msk.bf16.mxu0 %vm1287_vm0, %v1286_v0 }
 0x40c   : > { %v1122_v20 = vpop.eup %1121 }
 0x40d   : > { %v670_v21 = vmul.f32 %v1122_v20, %v1114_v59 }
 0x40f   : > { %v671_v22 = vpack.c.bf16 %v670_v21, %v670_v21 }
 0x412   : > { %1007 = vmatmul.mubr.msk.bf16.vlgmr.msra.gmra.mrb[16].mxu0 %vm282_vm2, %v671_v22 }
 0x4b0   : > { %v384_v23 = vpop.f32.mrb[4].mxu0 }
 0x4b1   : > { %v972_v24 = vpop.f32.mrb[5].mxu0 }
 0x4b2   : > { %v387_v25 = vpop.f32.mrb[6].mxu0 }
 0x4b3   : > { %v973_v26 = vpop.f32.mrb[7].mxu0 }
 0x4b8   : > { %v494_v27 = vpop.f32.mrb[8].mxu0 }
 0x4b9   : > { %721 = vrot.lane.b32.xlu1 %v494_v27, %s1299_s11  ;;  %v984_v28 = vpop.f32.mrb[9].mxu0 }
 0x4ba   : > { %v497_v29 = vpop.f32.mrb[10].mxu0 }
 0x4bb   : > { %v985_v30 = vpop.f32.mrb[11].mxu0 }
 0x4dd   : > { %v604_v33 = vpop.f32.mrb[12].mxu0 }
 0x4de   : > { %725 = vrot.lane.b32.xlu0 %v604_v33, %s1300_s25  ;;  %v996_v34 = vpop.f32.mrb[13].mxu0 }
 0x4df   : > { %v607_v35 = vpop.f32.mrb[14].mxu0 }
 0x4e0   : > { %v997_v36 = vpop.f32.mrb[15].mxu0 }
 0x4e5   : > { %v714_v37 = vpop.f32.mrb[16].mxu0 }
 0x4e6   : > { %729 = vrot.lane.b32.xlu1 %v714_v37, %s1301_s7  ;;  %v1008_v38 = vpop.f32.mrb[17].mxu0 }
 0x4e7   : > { %v717_v39 = vpop.f32.mrb[18].mxu0 }
 0x4e8   : > { %v1009_v40 = vpop.f32.mrb[19].mxu0 }
 0x52b   : > { %v722_v41 = vpop.permute.xlu1 %721 }
 0x52c   : > { %v732_v0 = vsel %vm282_vm2, %v384_v23, %v722_v41 }
 0x550   : > { %v726_v42 = vpop.permute.xlu0 %725 }
 0x551   : > { %v734_v43 = vsel %vm733_vm4, %v732_v0, %v726_v42 }
 0x558   : > { %v730_v44 = vpop.permute.xlu1 %729 }
 0x559   : > { %v736_v45 = vsel %vm735_vm5, %v734_v43, %v730_v44 }
 0x55a   : > { %v737_v46 = vpack.c.bf16 %v736_v45, %v736_v45 }
 0x55c   : > { %1015 = vmatmul.mubr.msk.bf16.vlgmr.msra.gmra.mrb[16].mxu1 %vm234_vm1, %v737_v46 }
 0x62f   : > { %v791_v47 = vpop.f32.mrb[16].mxu1 }
 0x630   : > { %v797_v48 = vadd.f32 %v791_v47, %v1512_v3  ;;  %v1016_v49 = vpop.f32.mrb[17].mxu1 }
 0x631   : > { %v794_v50 = vpop.f32.mrb[18].mxu1 }
 0x632   : > { %v1017_v51 = vpop.f32.mrb[19].mxu1  ;;  %798 = vst.msk [vmem:[%s214_s22] sm:$0xff] %vm234_vm1, %v797_v48 }
 0x633   : > { %1222 = shalt.err (!%p1219_p2)
}
 0x634   : > { %s1223_s8 = scalar_lea.hbm %s1590_s24, 128  ;;  %s1227_s5 = scalar_lea.hbm %s1638_s3, 256 }
 0x635   : > { %p1224_p13 = scmp.ne.s32.totalorder %s1590_s24, %s1223_s8  ;;  %p1228_p4 = scmp.lt.u32.totalorder %s1590_s24, %s1638_s3 }
 0x636   : > { %p1229_p5 = scmp.lt.u32.totalorder %s1227_s5, %s1223_s8  ;;  %p1231_p11 = scmp.lt.u32.totalorder %s1223_s8, %s1590_s24 }
 0x637   : > { %p1225_p6 = pnand %p1224_p13, %p1652_p0 }
 0x638   : > { %p1230_p8 = por %p1229_p5, %p1228_p4 }
 0x639   : > { %p1226_p10 = pneg %p1225_p6 }
 0x63a   : > { %p1232_p1 = por %p1231_p11, %p1230_p8 }
 0x63c   : > { %p1233_p3 = pnand %p1232_p1, %p1226_p10 }
 0x63e   : > { %1236 = shalt.err (!%p1233_p3)
}
 0x63f   : > { %1028 = dma.vmem_to_hbm [thread:$0]  (%p1652_p0), %s1592_s18, 128, %s1590_s24, %s800_s16  }
 0x640 PF: > { %s825_s25 = sand.u32 1, %s1267_s12   ;;  %p1653_p7 = scmp.ne.s32.totalorder %s1643_s19, 0 }
 0x641   : > { %p1654_p9 = scmp.ge.s32.totalorder %s1279_s15, 2  ;;  %s826_s7 = scalar_lea.sflag [#allocation4], %s825_s25 }
 0x643   : > { %p1042_p12 = pnand %p1654_p9, %p1653_p7 }
 0x645   : > { %1262 = dma.done.wait (!%p1042_p12), %s826_s7, 128  }
 0x646   : > { %1264 = vsyncadd (!%p1042_p12), %s826_s7, 4294967168  ;;  %p17_p2 = scmp.ge.s32.totalorder %s1433_s4, 4   ;;  %s1655_s12 = smov %s1271_s13 }
 0x647   : > { %s1656_s13 = smov %s1275_s14  ;;  %s1657_s14 = smov %s1449_s9 }
 0x648   : > { %s1658_s15 = smov %s1433_s4  ;;  %19 = sbr.rel (!%p17_p2) target bundleno = 6 (0x6), region = 85 }
 0x64f   :  { %831 = vsyncpa [#allocation3], 1 }
 0x650   :  { %833 = vsyncpa [#allocation3 + $0x1], 1 }
 0x651   :  { %834 = vsyncpa [#allocation6], 1 }
 0x652   :  { %835 = vsyncpa [#allocation4], 1 }
 0x653   :  { %837 = vsyncpa [#allocation4 + $0x1], 1 }

</bundles_post_ra>
